<compile_context>
chip_gen: v7x
topology: tpu7x:2x2x1
jax: 0.10.0
libtpu: 0.0.40
codegen_flags: <defaults>
</compile_context>

<pallas_src>
import functools

import jax
import jax.numpy as jnp
from jax.experimental import pallas as pl
from jax.experimental.pallas import tpu as pltpu

LEAKY_SLOPE = 0.01  # PyTorch nn.LeakyReLU default negative_slope


def _leaky_relu(h):
    return jnp.where(h > 0, h, LEAKY_SLOPE * h)


def _head_tail(h1, w2_ref, b2_ref, w3_ref, b3):
    """Layers 2+3 of one head. h1: (TM, d) compute dtype -> (TM, 1) f32."""
    h2 = _leaky_relu(
        jnp.dot(h1, w2_ref[...], preferred_element_type=jnp.float32) + b2_ref[...])
    # Linear(d_model, 1) as an MXU matmul (keeps work off the XLU).
    return jnp.dot(h2, w3_ref[...], preferred_element_type=jnp.float32) + b3


def _expr_decoder_kernel(x_ref, w1_ref, b1_ref, w2_ref, b2_ref, w3_ref, b3_ref,
                         pred_ref):
    x = x_ref[...].astype(w1_ref.dtype)
    h1 = _leaky_relu(
        jnp.dot(x, w1_ref[...], preferred_element_type=jnp.float32) + b1_ref[...])
    h1 = h1.astype(w2_ref.dtype)
    pred_ref[...] = _head_tail(h1, w2_ref, b2_ref, w3_ref, b3_ref[0])


def _expr_decoder_kernel_zero(x_ref, w1c_ref, b1c_ref,
                              w2_ref, b2_ref, w3_ref,
                              zw2_ref, zb2_ref, zw3_ref, b3_ref,
                              pred_ref, zero_ref):
    d = w2_ref.shape[0]
    x = x_ref[...].astype(w1c_ref.dtype)
    # Single layer-1 MXU pass covering BOTH heads (N = 2*d_model).
    h1c = _leaky_relu(
        jnp.dot(x, w1c_ref[...], preferred_element_type=jnp.float32) + b1c_ref[...])
    h1c = h1c.astype(w2_ref.dtype)
    pred_ref[...] = _head_tail(h1c[:, :d], w2_ref, b2_ref, w3_ref, b3_ref[0])
    zlog = _head_tail(h1c[:, d:], zw2_ref, zb2_ref, zw3_ref, b3_ref[1])
    zero_ref[...] = jax.nn.sigmoid(zlog)


def init_expr_decoder_params(key, d_model, explicit_zero_prob=False,
                             use_batch_labels=False, use_mod=False):
    """Deterministic synthetic f32 parameters matching the PyTorch module."""
    d_in = d_model * 2 if (use_batch_labels or use_mod) else d_model

    def linear(k, fan_in, fan_out):
        kw, kb = jax.random.split(k)
        bound = 1.0 / jnp.sqrt(fan_in)
        w = jax.random.uniform(kw, (fan_in, fan_out), jnp.float32, -bound, bound)
        b = jax.random.uniform(kb, (fan_out,), jnp.float32, -bound, bound)
        return w, b

    keys = jax.random.split(key, 6)

    def head(ks):
        w1, b1 = linear(ks[0], d_in, d_model)
        w2, b2 = linear(ks[1], d_model, d_model)
        w3, b3 = linear(ks[2], d_model, 1)
        return dict(w1=w1, b1=b1, w2=w2, b2=b2, w3=w3, b3=b3)

    params = {"fc": head(keys[:3])}
    if explicit_zero_prob:
        params["zero_logit"] = head(keys[3:])
    return params


def pack_expr_decoder_params(params, explicit_zero_prob=False,
                             compute_dtype=jnp.bfloat16):
    """One-time host-side packing into the layout the kernel consumes."""
    fc = params["fc"]
    d_model = fc["w2"].shape[0]
    if explicit_zero_prob:
        zl = params["zero_logit"]
        return dict(
            w1=jnp.concatenate([fc["w1"], zl["w1"]], axis=1).astype(compute_dtype),
            b1=jnp.concatenate([fc["b1"], zl["b1"]]).reshape(1, 2 * d_model)
                 .astype(jnp.float32),
            w2=fc["w2"].astype(compute_dtype),
            b2=fc["b2"].reshape(1, d_model).astype(jnp.float32),
            w3=fc["w3"].astype(jnp.float32).reshape(d_model, 1),
            zw2=zl["w2"].astype(compute_dtype),
            zb2=zl["b2"].reshape(1, d_model).astype(jnp.float32),
            zw3=zl["w3"].astype(jnp.float32).reshape(d_model, 1),
            b3=jnp.stack([fc["b3"][0], zl["b3"][0]]).astype(jnp.float32),
        )
    return dict(
        w1=fc["w1"].astype(compute_dtype),
        b1=fc["b1"].reshape(1, d_model).astype(jnp.float32),
        w2=fc["w2"].astype(compute_dtype),
        b2=fc["b2"].reshape(1, d_model).astype(jnp.float32),
        w3=fc["w3"].astype(jnp.float32).reshape(d_model, 1),
        b3=fc["b3"].astype(jnp.float32).reshape(1),
    )


@functools.partial(jax.jit, static_argnames=("explicit_zero_prob", "tm"))
def expr_decoder_forward(packed, x, explicit_zero_prob=False, tm=512):
    """x: (batch, seq_len, d_in) -> dict(pred=(batch, seq_len)[, zero_probs])."""
    B, S, d_in = x.shape
    d_model = packed["w2"].shape[0]
    heads = 2 if explicit_zero_prob else 1
    w1_cols = packed["w1"].shape[1]           # d_model or 2*d_model

    M = B * S
    # Big row tile to amortize per-step overhead; clamp to M so tiny inputs use
    # block == full array. Default 512 keeps the parallel row grid non-trivial
    # (matters for v7x's 2 TensorCores).
    TM = min(tm, M)
    grid = (pl.cdiv(M, TM),)

    x2 = x.reshape(M, d_in)                   # free view: no pad, no astype

    const2d = lambda r, c: pl.BlockSpec((r, c), lambda i: (0, 0))
    x_spec = pl.BlockSpec((TM, d_in), lambda i: (i, 0))
    smem_spec = pl.BlockSpec(memory_space=pltpu.MemorySpace.SMEM)

    if explicit_zero_prob:
        kernel = _expr_decoder_kernel_zero
        in_specs = [
            x_spec,
            const2d(d_in, w1_cols), const2d(1, w1_cols),       # w1cat, b1cat
            const2d(d_model, d_model), const2d(1, d_model),    # w2, b2
            const2d(d_model, 1),                               # w3 column
            const2d(d_model, d_model), const2d(1, d_model),    # zw2, zb2
            const2d(d_model, 1),                               # zw3 column
            smem_spec,                                         # [b3, zb3] in SMEM
        ]
        args = [x2, packed["w1"], packed["b1"], packed["w2"], packed["b2"],
                packed["w3"], packed["zw2"], packed["zb2"], packed["zw3"],
                packed["b3"]]
        out_shape = (jax.ShapeDtypeStruct((M, 1), jnp.float32),
                     jax.ShapeDtypeStruct((M, 1), jnp.float32))
        out_specs = (pl.BlockSpec((TM, 1), lambda i: (i, 0)),
                     pl.BlockSpec((TM, 1), lambda i: (i, 0)))
    else:
        kernel = _expr_decoder_kernel
        in_specs = [
            x_spec,
            const2d(d_in, w1_cols), const2d(1, w1_cols),
            const2d(d_model, d_model), const2d(1, d_model),
            const2d(d_model, 1),
            smem_spec,
        ]
        args = [x2, packed["w1"], packed["b1"], packed["w2"], packed["b2"],
                packed["w3"], packed["b3"]]
        out_shape = jax.ShapeDtypeStruct((M, 1), jnp.float32)
        out_specs = pl.BlockSpec((TM, 1), lambda i: (i, 0))

    # Advisory cost estimate for the XLA scheduler.
    bytes_weights = sum(int(v.size) * jnp.dtype(v.dtype).itemsize
                        for v in packed.values())
    flops = 2 * M * (d_in * w1_cols + heads * (d_model * d_model + d_model))
    cost = pl.CostEstimate(
        flops=int(flops),
        transcendentals=int(M if explicit_zero_prob else 0),
        bytes_accessed=int(M * d_in * jnp.dtype(x2.dtype).itemsize
                           + bytes_weights + heads * M * 4))

    # Raise the scoped-VMEM cap only when the tile/weight footprint needs it
    # (small problems keep the conservative defaults; ceiling stays under every
    # generation's physical VMEM, including v7x's 64 MiB).
    cdt = jnp.dtype(packed["w1"].dtype).itemsize
    vmem_est = (2 * TM * d_in * jnp.dtype(x2.dtype).itemsize   # 2x-buffered x
                + 2 * bytes_weights                            # 2x-buffered weights
                + 2 * heads * TM * 4                           # 2x-buffered outputs
                + TM * (w1_cols * (4 + cdt) + heads * d_model * 4))  # intermediates
    vmem_limit = None
    if vmem_est > 12 * 1024 * 1024:
        vmem_limit = int(min(max(2 * vmem_est, 32 * 1024 * 1024),
                             56 * 1024 * 1024))

    out = pl.pallas_call(
        kernel,
        out_shape=out_shape,
        grid_spec=pltpu.PrefetchScalarGridSpec(
            num_scalar_prefetch=0,
            grid=grid,
            in_specs=in_specs,
            out_specs=out_specs,
        ),
        compiler_params=pltpu.CompilerParams(
            dimension_semantics=("parallel",),
            vmem_limit_bytes=vmem_limit),
        cost_estimate=cost,
    )(*args)

    if explicit_zero_prob:
        pred, zero = out
        return dict(pred=pred.reshape(B, S), zero_probs=zero.reshape(B, S))
    return dict(pred=out.reshape(B, S))


def _reference_forward(params, x, explicit_zero_prob):
    """Pure-JAX f32 reference mirroring the PyTorch forward."""
    def head(p, x):
        h = _leaky_relu(x @ p["w1"] + p["b1"])
        h = _leaky_relu(h @ p["w2"] + p["b2"])
        return (h @ p["w3"])[..., 0] + p["b3"][0]   # squeeze(-1)

    out = dict(pred=head(params["fc"], x))
    if explicit_zero_prob:
        out["zero_probs"] = jax.nn.sigmoid(head(params["zero_logit"], x))
    return out


if __name__ == "__main__":
    d_model = 32
    batch, seq_len = 2, 8
    explicit_zero_prob = True   # exercise both heads

    key = jax.random.PRNGKey(0)
    kp, kx = jax.random.split(key)
    params = init_expr_decoder_params(kp, d_model,
                                      explicit_zero_prob=explicit_zero_prob)
    x = jax.random.normal(kx, (batch, seq_len, d_model), jnp.float32)

    # Kernel path: bf16 operands on the MXU, f32 accumulation / epilogues.
    packed = pack_expr_decoder_params(params, explicit_zero_prob,
                                      compute_dtype=jnp.bfloat16)
    out = expr_decoder_forward(packed, x.astype(jnp.bfloat16),
                               explicit_zero_prob=explicit_zero_prob)
    jax.block_until_ready(out)

    ref = _reference_forward(params, x, explicit_zero_prob)
    assert out["pred"].shape == (batch, seq_len)
    # bf16 matmul inputs (f32 accumulation) vs f32 reference: loosened tolerance.
    assert jnp.allclose(out["pred"], ref["pred"], atol=5e-2, rtol=5e-2)
    if explicit_zero_prob:
        assert out["zero_probs"].shape == (batch, seq_len)
        assert jnp.allclose(out["zero_probs"], ref["zero_probs"],
                            atol=5e-2, rtol=5e-2)

    print("KERNEL_OK")
</pallas_src>

<mosaic_0001>
module attributes {stable_mosaic.version = 11 : i64} {
  func.func @_expr_decoder_kernel_zero(%arg0: i32, %arg1: memref<16x32xbf16, #tpu.memory_space<vmem>>, %arg2: memref<32x64xbf16, #tpu.memory_space<vmem>>, %arg3: memref<1x64xf32, #tpu.memory_space<vmem>>, %arg4: memref<32x32xbf16, #tpu.memory_space<vmem>>, %arg5: memref<1x32xf32, #tpu.memory_space<vmem>>, %arg6: memref<32x1xf32, #tpu.memory_space<vmem>>, %arg7: memref<32x32xbf16, #tpu.memory_space<vmem>>, %arg8: memref<1x32xf32, #tpu.memory_space<vmem>>, %arg9: memref<32x1xf32, #tpu.memory_space<vmem>>, %arg10: memref<2xf32, #tpu.memory_space<smem>>, %arg11: memref<16x1xf32, #tpu.memory_space<vmem>>, %arg12: memref<16x1xf32, #tpu.memory_space<vmem>>) attributes {dimension_semantics = [#tpu.dimension_semantics<parallel>], iteration_bounds = array<i64: 1>, scalar_prefetch = 0 : i64, scratch_operands = 0 : i64, tpu.core_type = #tpu.core_type<tc>, window_params = [{transform_indices = @transform_0, window_bounds = array<i64: 16, 32>}, {pipeline_mode = #tpu.pipeline_mode<synchronous>, transform_indices = @transform_1, window_bounds = array<i64: 32, 64>}, {pipeline_mode = #tpu.pipeline_mode<synchronous>, transform_indices = @transform_2, window_bounds = array<i64: 1, 64>}, {pipeline_mode = #tpu.pipeline_mode<synchronous>, transform_indices = @transform_3, window_bounds = array<i64: 32, 32>}, {pipeline_mode = #tpu.pipeline_mode<synchronous>, transform_indices = @transform_4, window_bounds = array<i64: 1, 32>}, {pipeline_mode = #tpu.pipeline_mode<synchronous>, transform_indices = @transform_5, window_bounds = array<i64: 32, 1>}, {pipeline_mode = #tpu.pipeline_mode<synchronous>, transform_indices = @transform_6, window_bounds = array<i64: 32, 32>}, {pipeline_mode = #tpu.pipeline_mode<synchronous>, transform_indices = @transform_7, window_bounds = array<i64: 1, 32>}, {pipeline_mode = #tpu.pipeline_mode<synchronous>, transform_indices = @transform_8, window_bounds = array<i64: 32, 1>}, {transform_indices = @transform_9, window_bounds = array<i64: 2>}, {transform_indices = @transform_10, window_bounds = array<i64: 16, 1>}, {transform_indices = @transform_11, window_bounds = array<i64: 16, 1>}]} {
    %c0 = arith.constant 0 : index
    %c0_0 = arith.constant 0 : index
    %0 = vector.load %arg1[%c0, %c0_0] : memref<16x32xbf16, #tpu.memory_space<vmem>>, vector<16x32xbf16>
    %c0_1 = arith.constant 0 : index
    %c0_2 = arith.constant 0 : index
    %1 = vector.load %arg2[%c0_1, %c0_2] : memref<32x64xbf16, #tpu.memory_space<vmem>>, vector<32x64xbf16>
    %cst = arith.constant dense<0.000000e+00> : vector<16x64xf32>
    %2 = tpu.matmul %0, %1, %cst {dimension_numbers = #tpu.dot_dimension_numbers<[1], [0], [0], [1], [0, 0, 1, 1], [], []>} : vector<16x32xbf16>, vector<32x64xbf16>, vector<16x64xf32> -> vector<16x64xf32>
    %c0_3 = arith.constant 0 : index
    %c0_4 = arith.constant 0 : index
    %3 = vector.load %arg3[%c0_3, %c0_4] : memref<1x64xf32, #tpu.memory_space<vmem>>, vector<1x64xf32>
    %4 = vector.broadcast %3 : vector<1x64xf32> to vector<16x64xf32>
    %5 = arith.addf %2, %4 : vector<16x64xf32>
    %cst_5 = arith.constant 0.000000e+00 : f32
    %6 = vector.broadcast %cst_5 : f32 to vector<16x64xf32>
    %7 = arith.cmpf ogt, %5, %6 : vector<16x64xf32>
    %cst_6 = arith.constant 0.00999999977 : f32
    %8 = vector.broadcast %cst_6 : f32 to vector<16x64xf32>
    %9 = arith.mulf %8, %5 : vector<16x64xf32>
    %10 = arith.select %7, %5, %9 : vector<16x64xi1>, vector<16x64xf32>
    %11 = arith.truncf %10 : vector<16x64xf32> to vector<16x64xbf16>
    %12 = vector.extract_strided_slice %11 {offsets = [0, 0], sizes = [16, 32], strides = [1, 1]} : vector<16x64xbf16> to vector<16x32xbf16>
    %c0_7 = arith.constant 0 : index
    %13 = memref.load %arg10[%c0_7] : memref<2xf32, #tpu.memory_space<smem>>
    %c0_8 = arith.constant 0 : index
    %c0_9 = arith.constant 0 : index
    %14 = vector.load %arg4[%c0_8, %c0_9] : memref<32x32xbf16, #tpu.memory_space<vmem>>, vector<32x32xbf16>
    %cst_10 = arith.constant dense<0.000000e+00> : vector<16x32xf32>
    %15 = tpu.matmul %12, %14, %cst_10 {dimension_numbers = #tpu.dot_dimension_numbers<[1], [0], [0], [1], [0, 0, 1, 1], [], []>} : vector<16x32xbf16>, vector<32x32xbf16>, vector<16x32xf32> -> vector<16x32xf32>
    %c0_11 = arith.constant 0 : index
    %c0_12 = arith.constant 0 : index
    %16 = vector.load %arg5[%c0_11, %c0_12] : memref<1x32xf32, #tpu.memory_space<vmem>>, vector<1x32xf32>
    %17 = vector.broadcast %16 : vector<1x32xf32> to vector<16x32xf32>
    %18 = arith.addf %15, %17 : vector<16x32xf32>
    %cst_13 = arith.constant 0.000000e+00 : f32
    %19 = vector.broadcast %cst_13 : f32 to vector<16x32xf32>
    %20 = arith.cmpf ogt, %18, %19 : vector<16x32xf32>
    %cst_14 = arith.constant 0.00999999977 : f32
    %21 = vector.broadcast %cst_14 : f32 to vector<16x32xf32>
    %22 = arith.mulf %21, %18 : vector<16x32xf32>
    %23 = arith.select %20, %18, %22 : vector<16x32xi1>, vector<16x32xf32>
    %c0_15 = arith.constant 0 : index
    %c0_16 = arith.constant 0 : index
    %24 = vector.load %arg6[%c0_15, %c0_16] : memref<32x1xf32, #tpu.memory_space<vmem>>, vector<32x1xf32>
    %cst_17 = arith.constant dense<0.000000e+00> : vector<16x1xf32>
    %25 = tpu.matmul %23, %24, %cst_17 {dimension_numbers = #tpu.dot_dimension_numbers<[1], [0], [0], [1], [0, 0, 1, 1], [], []>} : vector<16x32xf32>, vector<32x1xf32>, vector<16x1xf32> -> vector<16x1xf32>
    %26 = vector.broadcast %13 : f32 to vector<16x1xf32>
    %27 = arith.addf %25, %26 : vector<16x1xf32>
    %c0_18 = arith.constant 0 : index
    %c0_19 = arith.constant 0 : index
    %28 = vector.load %arg11[%c0_18, %c0_19] : memref<16x1xf32, #tpu.memory_space<vmem>>, vector<16x1xf32>
    tpu.vector_store %arg11[%c0_18, %c0_19], %27 {strides = array<i32>} : memref<16x1xf32, #tpu.memory_space<vmem>>, vector<16x1xf32>,
    %29 = vector.extract_strided_slice %11 {offsets = [0, 32], sizes = [16, 32], strides = [1, 1]} : vector<16x64xbf16> to vector<16x32xbf16>
    %c1 = arith.constant 1 : index
    %30 = memref.load %arg10[%c1] : memref<2xf32, #tpu.memory_space<smem>>
    %c0_20 = arith.constant 0 : index
    %c0_21 = arith.constant 0 : index
    %31 = vector.load %arg7[%c0_20, %c0_21] : memref<32x32xbf16, #tpu.memory_space<vmem>>, vector<32x32xbf16>
    %cst_22 = arith.constant dense<0.000000e+00> : vector<16x32xf32>
    %32 = tpu.matmul %29, %31, %cst_22 {dimension_numbers = #tpu.dot_dimension_numbers<[1], [0], [0], [1], [0, 0, 1, 1], [], []>} : vector<16x32xbf16>, vector<32x32xbf16>, vector<16x32xf32> -> vector<16x32xf32>
    %c0_23 = arith.constant 0 : index
    %c0_24 = arith.constant 0 : index
    %33 = vector.load %arg8[%c0_23, %c0_24] : memref<1x32xf32, #tpu.memory_space<vmem>>, vector<1x32xf32>
    %34 = vector.broadcast %33 : vector<1x32xf32> to vector<16x32xf32>
    %35 = arith.addf %32, %34 : vector<16x32xf32>
    %cst_25 = arith.constant 0.000000e+00 : f32
    %36 = vector.broadcast %cst_25 : f32 to vector<16x32xf32>
    %37 = arith.cmpf ogt, %35, %36 : vector<16x32xf32>
    %cst_26 = arith.constant 0.00999999977 : f32
    %38 = vector.broadcast %cst_26 : f32 to vector<16x32xf32>
    %39 = arith.mulf %38, %35 : vector<16x32xf32>
    %40 = arith.select %37, %35, %39 : vector<16x32xi1>, vector<16x32xf32>
    %c0_27 = arith.constant 0 : index
    %c0_28 = arith.constant 0 : index
    %41 = vector.load %arg9[%c0_27, %c0_28] : memref<32x1xf32, #tpu.memory_space<vmem>>, vector<32x1xf32>
    %cst_29 = arith.constant dense<0.000000e+00> : vector<16x1xf32>
    %42 = tpu.matmul %40, %41, %cst_29 {dimension_numbers = #tpu.dot_dimension_numbers<[1], [0], [0], [1], [0, 0, 1, 1], [], []>} : vector<16x32xf32>, vector<32x1xf32>, vector<16x1xf32> -> vector<16x1xf32>
    %43 = vector.broadcast %30 : f32 to vector<16x1xf32>
    %44 = arith.addf %42, %43 : vector<16x1xf32>
    %45 = arith.negf %44 : vector<16x1xf32>
    %46 = math.exp %45 : vector<16x1xf32>
    %cst_30 = arith.constant 1.000000e+00 : f32
    %47 = vector.broadcast %cst_30 : f32 to vector<16x1xf32>
    %48 = arith.addf %47, %46 : vector<16x1xf32>
    %49 = arith.divf %47, %48 : vector<16x1xf32>
    %c0_31 = arith.constant 0 : index
    %c0_32 = arith.constant 0 : index
    %50 = vector.load %arg12[%c0_31, %c0_32] : memref<16x1xf32, #tpu.memory_space<vmem>>, vector<16x1xf32>
    tpu.vector_store %arg12[%c0_31, %c0_32], %49 {strides = array<i32>} : memref<16x1xf32, #tpu.memory_space<vmem>>, vector<16x1xf32>,
    return
  }
  func.func @transform_0(%arg0: i32) -> (i32, i32) {
    %c0_i32 = arith.constant 0 : i32
    %c0_i32_0 = arith.constant 0 : i32
    return %arg0, %c0_i32 : i32, i32
  }
  func.func @transform_1(%arg0: i32) -> (i32, i32) {
    %c0_i32 = arith.constant 0 : i32
    %c0_i32_0 = arith.constant 0 : i32
    %c0_i32_1 = arith.constant 0 : i32
    return %c0_i32, %c0_i32_0 : i32, i32
  }
  func.func @transform_2(%arg0: i32) -> (i32, i32) {
    %c0_i32 = arith.constant 0 : i32
    %c0_i32_0 = arith.constant 0 : i32
    %c0_i32_1 = arith.constant 0 : i32
    return %c0_i32, %c0_i32_0 : i32, i32
  }
  func.func @transform_3(%arg0: i32) -> (i32, i32) {
    %c0_i32 = arith.constant 0 : i32
    %c0_i32_0 = arith.constant 0 : i32
    %c0_i32_1 = arith.constant 0 : i32
    return %c0_i32, %c0_i32_0 : i32, i32
  }
  func.func @transform_4(%arg0: i32) -> (i32, i32) {
    %c0_i32 = arith.constant 0 : i32
    %c0_i32_0 = arith.constant 0 : i32
    %c0_i32_1 = arith.constant 0 : i32
    return %c0_i32, %c0_i32_0 : i32, i32
  }
  func.func @transform_5(%arg0: i32) -> (i32, i32) {
    %c0_i32 = arith.constant 0 : i32
    %c0_i32_0 = arith.constant 0 : i32
    %c0_i32_1 = arith.constant 0 : i32
    return %c0_i32, %c0_i32_0 : i32, i32
  }
  func.func @transform_6(%arg0: i32) -> (i32, i32) {
    %c0_i32 = arith.constant 0 : i32
    %c0_i32_0 = arith.constant 0 : i32
    %c0_i32_1 = arith.constant 0 : i32
    return %c0_i32, %c0_i32_0 : i32, i32
  }
  func.func @transform_7(%arg0: i32) -> (i32, i32) {
    %c0_i32 = arith.constant 0 : i32
    %c0_i32_0 = arith.constant 0 : i32
    %c0_i32_1 = arith.constant 0 : i32
    return %c0_i32, %c0_i32_0 : i32, i32
  }
  func.func @transform_8(%arg0: i32) -> (i32, i32) {
    %c0_i32 = arith.constant 0 : i32
    %c0_i32_0 = arith.constant 0 : i32
    %c0_i32_1 = arith.constant 0 : i32
    return %c0_i32, %c0_i32_0 : i32, i32
  }
  func.func @transform_9(%arg0: i32) -> i32 {
    %c0_i32 = arith.constant 0 : i32
    %c0_i32_0 = arith.constant 0 : i32
    return %c0_i32 : i32
  }
  func.func @transform_10(%arg0: i32) -> (i32, i32) {
    %c0_i32 = arith.constant 0 : i32
    %c0_i32_0 = arith.constant 0 : i32
    return %arg0, %c0_i32 : i32, i32
  }
  func.func @transform_11(%arg0: i32) -> (i32, i32) {
    %c0_i32 = arith.constant 0 : i32
    %c0_i32_0 = arith.constant 0 : i32
    return %arg0, %c0_i32 : i32, i32
  }
}

</mosaic_0001>

<bundles_post_ra>
// kernel: expr_decoder_forward.1
= control target key start
LH: loop header
LB: loop body
LE: loop exit
PB: predicated region body
PF: predicated region fallthrough
CT: control target
= control target key end

     0   :  { %17 = vsyncpa [#allocation3], 0  ;;  %s765_s0 = inlined_call_operand.vmem [shape: bf16[16,32], index: 0, kind: input, shape index: {}]   ;;  %s766_s1 = inlined_call_operand.vmem [shape: bf16[32,64], index: 1, kind: input, shape index: {}]   ;;  %s767_s2 = inlined_call_operand.vmem [shape: f32[1,64], index: 2, kind: input, shape index: {}]   ;;  %s768_s3 = inlined_call_operand.vmem [shape: bf16[32,32], index: 3, kind: input, shape index: {}]   ;;  %s769_s4 = inlined_call_operand.vmem [shape: f32[1,32], index: 4, kind: input, shape index: {}]   ;;  %s770_s5 = inlined_call_operand.vmem [shape: f32[32,1], index: 5, kind: input, shape index: {}]   ;;  %s771_s6 = inlined_call_operand.vmem [shape: bf16[32,32], index: 6, kind: input, shape index: {}]   ;;  %s772_s7 = inlined_call_operand.vmem [shape: f32[1,32], index: 7, kind: input, shape index: {}]   ;;  %s773_s8 = inlined_call_operand.vmem [shape: f32[32,1], index: 8, kind: input, shape index: {}]   ;;  %s774_s9 = inlined_call_operand.vmem [shape: f32[2], index: 9, kind: input, shape index: {}]   ;;  %s775_s10 = inlined_call_operand.vmem [shape: f32[16,1], index: 10, kind: output, shape index: {0}]   ;;  %s776_s11 = inlined_call_operand.vmem [shape: f32[16,1], index: 11, kind: output, shape index: {1}]  }
   0x1   :  { %s42_s19 = sshll.u32 %s774_s9, 4  ;;  %s43_s19 = int_to_ptr.vmem [resolvable:$true] %s42_s19 }
   0x2   :  { %s604_s20 = scalar_lea.vmem %s43_s19, 16  ;;  %p609_p1 = scmp.lt.s32.totalorder %s43_s19, %s43_s19 }
   0x3   :  { %p605_p0 = scmp.ne.s32.totalorder %s43_s19, %s604_s20  ;;  %p610_p2 = scmp.lt.s32.totalorder %s604_s20, %s604_s20 }
   0x5   :  { %p611_p3 = por %p610_p2, %p609_p1 }
   0x7   :  { %p612_p4 = pnand %p611_p3, %p605_p0 }
   0x9   :  { %615 = shalt.err (!%p612_p4)
}
   0xa   :  { %s618_s21 = smov [#allocation2]  }
   0xb   :  { %45 = dma.vmem_to_smem %s43_s19, 16, %s618_s21, [#allocation3]  }
   0xc   :  { %616 = dma.done.wait [#allocation3], 16  }
   0xd   :  { %617 = vsyncadd [#allocation3], 4294967280 }
   0xe   :  { %49 = sfence }
   0xf   :  { %v589_v0 = vld [vmem:[%s766_s1] sm:$0xff]   ;;  %v619_v1 = vmov 0.0   ;;  %v590_v2 = vld [vmem:[%s766_s1 + $0x8] sm:$0xff]   ;;  %vm620_vm0 = vmmov 0   ;;  %vm81_vm1 = vcmask 261120   ;;  %v209_v23 = vld [vmem:[%s770_s5 + $0x10] sm:$0xff] }
  0x10   :  { %523 = vmatprep.subr.bf16.mxu0 %v619_v1  ;;  %531 = vmatprep.subr.bf16.mxu1 %v619_v1  ;;  %v591_v3 = vld [vmem:[%s765_s0] sm:$0xff]   ;;  %v593_v5 = vld [vmem:[%s768_s3 + $0x8] sm:$0xff]   ;;  %v210_v24 = vld [vmem:[%s770_s5 + $0x18] sm:$0xff]  ;;  %vm293_vm8 = vcmask 7168  }
  0x11   :  { %524 = vmatpush3.bf16.msra.mxu0 %v589_v0  ;;  %527 = vmatprep.mubr.msk.bf16.mxu0 %vm620_vm0, %v619_v1  ;;  %v592_v4 = vld [vmem:[%s768_s3] sm:$0xff]   ;;  %v595_v19 = vld [vmem:[%s771_s6 + $0x8] sm:$0xff]   ;;  %v573_v25 = vpack.c.bf16 %v210_v24, %v209_v23  ;;  %v375_v38 = vld [vmem:[%s773_s8 + $0x10] sm:$0xff]  ;;  %s493_s3 = sld [smem:[#allocation2 + $0x1]] }
  0x12   :  { %525 = vmatprep.subr.bf16.mxu0 %v619_v1  ;;  %535 = vmatprep.mubr.msk.bf16.mxu1 %vm620_vm0, %v619_v1  ;;  %v482_v6 = vld [vmem:[%s767_s2] ss:$0 sm:$0xff]  ;;  %s621_s2 = smov 96   ;;  %v208_v21 = vld [vmem:[%s770_s5 + $0x8] sm:$0xff]  ;;  %v376_v39 = vld [vmem:[%s773_s8 + $0x18] sm:$0xff] }
  0x13   :  { %532 = vmatpush3.bf16.msra.mxu1 %v592_v4  ;;  %v594_v17 = vld [vmem:[%s771_s6] sm:$0xff]   ;;  %v374_v28 = vld [vmem:[%s773_s8 + $0x8] sm:$0xff]  ;;  %v581_v42 = vpack.c.bf16 %v376_v39, %v375_v38 }
  0x14   :  { %533 = vmatprep.subr.bf16.mxu1 %v619_v1  ;;  %v207_v20 = vld [vmem:[%s770_s5] sm:$0xff] }
  0x15   :  { %526 = vmatpush3.bf16.msra.mxu0 %v590_v2  ;;  %v569_v22 = vpack.c.bf16 %v208_v21, %v207_v20  ;;  %v373_v27 = vld [vmem:[%s773_s8] sm:$0xff]  ;;  %s133_s8 = sld [smem:[#allocation2]] }
  0x16   :  { %v577_v29 = vpack.c.bf16 %v374_v28, %v373_v27  ;;  %v487_v30 = vld [vmem:[%s769_s4] ss:$0 sm:$0xff] }
  0x17   :  { %534 = vmatpush3.bf16.msra.mxu1 %v593_v5  ;;  %570 = vmatprep.subr.bf16.mxu0 %v569_v22  ;;  %v494_v44 = vld [vmem:[%s772_s7] ss:$0 sm:$0xff]  ;;  %v377_v60 = vstv %s493_s3 }
  0x18   :  { %528 = vmatmul.mubr.msk.bf16.vlgmr.msra.gmra.mrb[0].mxu0 %vm81_vm1, %v591_v3  ;;  %550 = vmatprep.subr.bf16.mxu1 %v619_v1 }
  0x19   :  { %572 = vmatpush3.bf16.msra.mxu0 %v569_v22 }
  0x1a   :  { %574 = vmatprep.subr.bf16.mxu0 %v573_v25 }
  0x1b   :  { %v211_v55 = vstv %s133_s8 }
  0x1d   :  { %576 = vmatpush3.bf16.msra.mxu0 %v573_v25 }
  0x1e   :  { %578 = vmatprep.subr.bf16.mxu0 %v577_v29 }
  0xeb   :  { %v119_v7 = vpop.f32.mrb[0].mxu0 }
  0xec   :  { %v120_v8 = vadd.f32 %v482_v6, %v119_v7  ;;  %v529_v9 = vpop.f32.mrb[1].mxu0 }
  0xed   :  { %v122_v10 = vpop.f32.mrb[2].mxu0 }
  0xee   :  { %v128_v11 = vmul.f32 0.01, %v120_v8  ;;  %v123_v12 = vadd.f32 %v482_v6, %v122_v10  ;;  %v530_v13 = vpop.f32.mrb[3].mxu0  ;;  %vm126_vm2 = vcmp.gt.f32.partialorder %v120_v8, 0.0 }
  0xf0   :  { %vm127_vm3 = vcmp.gt.f32.partialorder %v123_v12, 0.0  ;;  %v129_v14 = vmul.f32 0.01, %v123_v12  ;;  %v130_v15 = vsel %vm126_vm2, %v120_v8, %v128_v11 }
  0xf2   :  { %v131_v16 = vsel %vm127_vm3, %v123_v12, %v129_v14 }
  0xf3   :  { %v132_v18 = vpack.c.bf16 %v131_v16, %v130_v15 }
  0xf5   :  { %536 = vmatmul.mubr.msk.bf16.vlgmr.msra.gmra.mrb[0].mxu1 %vm81_vm1, %v132_v18  ;;  %309 = vrot.lane.b32.xlu0 %v132_v18, %s621_s2 }
  0xf6   :  { %551 = vmatpush3.bf16.msra.mxu1 %v594_v17  ;;  %554 = vmatprep.mubr.msk.bf16.mxu1 %vm620_vm0, %v619_v1 }
  0xf7   :  { %552 = vmatprep.subr.bf16.mxu1 %v619_v1 }
  0xfa   :  { %553 = vmatpush3.bf16.msra.mxu1 %v595_v19 }
 0x167   :  { %v310_v26 = vpop.permute.xlu0 %309 }
 0x168   :  { %555 = vmatmul.mubr.msk.bf16.vlgmr.msra.gmra.mrb[4].mxu1 %vm81_vm1, %v310_v26 }
 0x1c8   :  { %v194_v31 = vpop.f32.mrb[0].mxu1 }
 0x1c9   :  { %v195_v32 = vadd.f32 %v487_v30, %v194_v31  ;;  %v537_v33 = vpop.f32.mrb[1].mxu1 }
 0x1ca   :  { %v197_v34 = vpop.f32.mrb[2].mxu1 }
 0x1cb   :  { %vm201_vm4 = vcmp.gt.f32.partialorder %v195_v32, 0.0  ;;  %v203_v35 = vmul.f32 0.01, %v195_v32  ;;  %v198_v36 = vadd.f32 %v487_v30, %v197_v34  ;;  %v538_v37 = vpop.f32.mrb[3].mxu1 }
 0x1cd   :  { %vm202_vm5 = vcmp.gt.f32.partialorder %v198_v36, 0.0  ;;  %v204_v40 = vmul.f32 0.01, %v198_v36  ;;  %v205_v41 = vsel %vm201_vm4, %v195_v32, %v203_v35 }
 0x1ce   :  { %547 = vmatprep.mubr.msk.f32.mxu0 %vm81_vm1, %v205_v41 }
 0x1cf   :  { %v206_v43 = vsel %vm202_vm5, %v198_v36, %v204_v40 }
 0x1d0   :  { %548 = vmatmul.mubr.msk.f32.vlgmr.msra.gmra.mrb[4].mxu0 %vm81_vm1, %v206_v43 }
 0x1d1   :  { %580 = vmatpush3.bf16.msra.mxu0 %v577_v29 }
 0x1d2   :  { %582 = vmatprep.subr.bf16.mxu0 %v581_v42 }
 0x1d5   :  { %584 = vmatpush3.bf16.msra.mxu0 %v581_v42 }
 0x23b   :  { %v360_v45 = vpop.f32.mrb[4].mxu1 }
 0x23c   :  { %v361_v46 = vadd.f32 %v494_v44, %v360_v45  ;;  %v556_v47 = vpop.f32.mrb[5].mxu1 }
 0x23d   :  { %v363_v48 = vpop.f32.mrb[6].mxu1 }
 0x23e   :  { %vm367_vm6 = vcmp.gt.f32.partialorder %v361_v46, 0.0  ;;  %v369_v49 = vmul.f32 0.01, %v361_v46  ;;  %v364_v50 = vadd.f32 %v494_v44, %v363_v48  ;;  %v557_v51 = vpop.f32.mrb[7].mxu1 }
 0x240   :  { %vm368_vm7 = vcmp.gt.f32.partialorder %v364_v50, 0.0  ;;  %v370_v52 = vmul.f32 0.01, %v364_v50  ;;  %v371_v53 = vsel %vm367_vm6, %v361_v46, %v369_v49 }
 0x241   :  { %566 = vmatprep.mubr.msk.f32.mxu0 %vm81_vm1, %v371_v53 }
 0x242   :  { %v372_v54 = vsel %vm368_vm7, %v364_v50, %v370_v52 }
 0x243   :  { %567 = vmatmul.mubr.msk.f32.vlgmr.msra.gmra.mrb[6].mxu0 %vm81_vm1, %v372_v54 }
 0x2a3   :  { %v549_v56 = vpop.f32.mrb[4].mxu0 }
 0x2a4   :  { %v290_v57 = vadd.f32 %v549_v56, %v211_v55  ;;  %v284_v58 = vpop.f32.mrb[5].mxu0 }
 0x2a5   :  { %v285_v59 = vadd.f32 %v284_v58, %v211_v55 }
 0x2a6   :  { %295 = vst.msk [vmem:[%s775_s10 + $0x8] sm:$0xff] %vm293_vm8, %v290_v57 }
 0x2a7   :  { %294 = vst.msk [vmem:[%s775_s10] sm:$0xff] %vm293_vm8, %v285_v59 }
 0x316   :  { %v568_v61 = vpop.f32.mrb[6].mxu0 }
 0x317   :  { %v456_v62 = vadd.f32 %v568_v61, %v377_v60  ;;  %v450_v63 = vpop.f32.mrb[7].mxu0 }
 0x318   :  { %v451_v0 = vadd.f32 %v450_v63, %v377_v60 }
 0x319   :  { %v501_v1 = vmul.f32 -1.442695, %v456_v62 }
 0x31a   :  { %v500_v2 = vmul.f32 -1.442695, %v451_v0 }
 0x31b   :  { %596 = vpow2.f32 %v501_v1 }
 0x31c   :  { %598 = vpow2.f32 %v500_v2 }
 0x325   :  { %v597_v3 = vpop.eup %596 }
 0x326   :  { %v599_v4 = vpop.eup %598  ;;  %v466_v5 = vadd.f32 1.0, %v597_v3 }
 0x327   :  { %v465_v6 = vadd.f32 1.0, %v599_v4 }
 0x328   :  { %600 = vrcp.f32 %v466_v5 }
 0x329   :  { %602 = vrcp.f32 %v465_v6 }
 0x332   :  { %v601_v7 = vpop.eup %600 }
 0x333   :  { %v603_v8 = vpop.eup %602  ;;  %472 = vst.msk [vmem:[%s776_s11 + $0x8] sm:$0xff] %vm293_vm8, %v601_v7 }
 0x334   :  { %471 = vst.msk [vmem:[%s776_s11] sm:$0xff] %vm293_vm8, %v603_v8 }
 0x335   :  { %481 = vsyncpa [#allocation3], 1 }

</bundles_post_ra>
